<compile_context>
chip_gen: v5e
topology: v5e:2x2
jax: 0.10.0
libtpu: 0.0.40
codegen_flags: <defaults>
</compile_context>

<pallas_src>
import jax
import jax.numpy as jnp
from jax.experimental import pallas as pl
from jax.experimental.pallas import tpu as pltpu


def _round_up(v, m):
    return ((v + m - 1) // m) * m


def _baseline_kernel(nv_ref, x_ref, mask_ref, w_ref, b_ref, o_ref, acc_ref, den_ref):
    # nv_ref:   [num_batch_tiles] int32 (SMEM) — #sequence tiles with valid tokens
    # x_ref:    [TB, TS, D]   input dtype
    # mask_ref: [TB, 1, TS]   input dtype
    # w_ref:    [D, Cp]       param dtype (f32, or bf16 when x is bf16)
    # b_ref:    [1, Cp]       float32
    # o_ref:    [TB, Cp]      float32
    # acc_ref:  [TB, 1, D]    float32 scratch (masked sum over S)
    # den_ref:  [TB, 1, 1]    float32 scratch (mask count over S)
    i = pl.program_id(0)
    k = pl.program_id(1)

    @pl.when(k == 0)
    def _init():
        acc_ref[...] = jnp.zeros_like(acc_ref)
        den_ref[...] = jnp.zeros_like(den_ref)

    # Skip sequence tiles that are entirely padding for this batch tile.
    @pl.when(k < nv_ref[i])
    def _accumulate():
        x = x_ref[...]                       # [TB, TS, D]
        m = mask_ref[...]                    # [TB, 1, TS]
        # Masked sum over S on the MXU (batched [1,TS]@[TS,D] per row),
        # accumulated in float32 scratch.
        acc_ref[...] += jnp.einsum(
            "bms,bsd->bmd", m, x, preferred_element_type=jnp.float32)
        den_ref[...] += jnp.sum(m.astype(jnp.float32), axis=2, keepdims=True)

    @pl.when(k == pl.num_programs(1) - 1)
    def _finalize():
        acc = acc_ref[:, 0, :]               # [TB, D]
        den = den_ref[:, 0, :]               # [TB, 1]
        # avg = sum / count. A fully-padded row gives inf/NaN, like the torch baseline.
        avg = acc * pl.reciprocal(den)
        # Dropout (eval mode) is the identity; classifier on the MXU.
        logits = jnp.dot(avg, w_ref[...], preferred_element_type=jnp.float32)
        o_ref[...] = (logits + b_ref[...]).astype(o_ref.dtype)


def baseline_forward(x, mask, weight, bias):
    """Masked mean pooling over the sequence dim followed by a linear layer.

    Args:
      x:      [B, S, D]  (float32 or bfloat16)
      mask:   [B, S]     (float / int; nonzero = valid token)
      weight: [D, C]     (transposed vs torch's [C, D])
      bias:   [C]
    Returns:
      [B, C] float32 logits.
    """
    B, S, D = x.shape
    C = weight.shape[1]
    x_dtype = x.dtype
    itemsize = jnp.dtype(x_dtype).itemsize
    mask2d = mask.astype(x_dtype)

    # --- generation-aware per-buffer budget -------------------------------
    try:
        vmem_cap = int(pltpu.get_tpu_info().vmem_capacity_bytes)
    except Exception:  # pragma: no cover - conservative fallback
        vmem_cap = 128 << 20
    max_block_bytes = (12 << 20) if vmem_cap <= (64 << 20) else (24 << 20)

    # --- classifier params: lane-pad classes; keep weight in input dtype when bf16
    Cp = max(128, _round_up(C, 128))
    w_dtype = jnp.bfloat16 if jnp.dtype(x_dtype) == jnp.bfloat16 else jnp.float32
    w_p = jnp.zeros((D, Cp), w_dtype).at[:, :C].set(weight.astype(w_dtype))
    b_p = jnp.zeros((1, Cp), jnp.float32).at[:, :C].set(
        bias.astype(jnp.float32).reshape(1, C))

    # --- batch tiling: pad B to a multiple of 8; prefer >= 2 batch blocks ----
    Bp = max(8, _round_up(B, 8))
    TB = 8
    if Bp > 8:
        for cand in (64, 32, 16):
            if (Bp % cand == 0 and Bp // cand >= 2
                    and cand * S * D * itemsize <= max_block_bytes):
                TB = cand
                break

    # --- sequence tiling: full S if it fits, else 128-aligned tile + zero-pad S
    if TB * S * D * itemsize <= max_block_bytes:
        TS, Sp = S, S
    else:
        TS = max(128, (max_block_bytes // (TB * D * itemsize)) // 128 * 128)
        Sp = _round_up(S, TS)

    # --- pad inputs (zero mask => padding contributes nothing) ---------------
    if (Bp, Sp) != (B, S):
        x = jnp.pad(x, ((0, Bp - B), (0, Sp - S), (0, 0)))
        mask2d = jnp.pad(mask2d, ((0, Bp - B), (0, Sp - S)))
    mask3d = mask2d.reshape(Bp, 1, Sp)

    n_bt = Bp // TB
    n_kt = Sp // TS

    # --- scalar prefetch: #valid sequence tiles per batch tile ---------------
    pos = jnp.arange(Sp, dtype=jnp.int32)
    valid_len = jnp.max(jnp.where(mask2d != 0, pos[None, :] + 1, 0), axis=1)  # [Bp]
    tile_len = jnp.max(valid_len.reshape(n_bt, TB), axis=1)                   # [n_bt]
    nv = ((tile_len + TS - 1) // TS).astype(jnp.int32)                        # [n_bt]

    def _clamp_k(k, nv_ref, i):
        # Re-use the last valid block index once past it -> no new DMA.
        return jnp.minimum(k, jnp.maximum(nv_ref[i] - 1, 0))

    x_map = lambda i, k, nv_ref: (i, _clamp_k(k, nv_ref, i), 0)
    m_map = lambda i, k, nv_ref: (i, 0, _clamp_k(k, nv_ref, i))
    w_map = lambda i, k, nv_ref: (0, 0)
    b_map = lambda i, k, nv_ref: (0, 0)
    o_map = lambda i, k, nv_ref: (i, 0)

    # --- VMEM accounting (double-buffered streams + resident params/scratch) -
    w_bytes = jnp.dtype(w_dtype).itemsize
    need = (
        2 * TB * TS * D * itemsize          # x (2 pipeline buffers)
        + 2 * TB * 8 * TS * itemsize        # mask (sublane-padded 1->8)
        + 2 * D * Cp * w_bytes              # classifier weight buffers
        + 2 * 8 * Cp * 4                    # bias buffers (sublane-padded)
        + 2 * TB * Cp * 4                   # output buffers
        + TB * 8 * D * 4 + TB * 8 * 128 * 4  # f32 scratch (tile-padded)
    )
    vmem_limit = int(min(vmem_cap, max(need + (2 << 20), 32 << 20)))

    cost = pl.CostEstimate(
        flops=2 * Bp * Sp * D + 2 * Bp * D * Cp,
        transcendentals=0,
        bytes_accessed=(Bp * Sp * (D + 1)) * itemsize
        + D * Cp * w_bytes + (Cp + Bp * Cp) * 4,
    )

    out = pl.pallas_call(
        _baseline_kernel,
        out_shape=jax.ShapeDtypeStruct((Bp, Cp), jnp.float32),
        grid_spec=pltpu.PrefetchScalarGridSpec(
            num_scalar_prefetch=1,
            grid=(n_bt, n_kt),
            in_specs=[
                pl.BlockSpec((TB, TS, D), x_map),   # x
                pl.BlockSpec((TB, 1, TS), m_map),   # mask
                pl.BlockSpec((D, Cp), w_map),       # classifier weight
                pl.BlockSpec((1, Cp), b_map),       # classifier bias
            ],
            out_specs=pl.BlockSpec((TB, Cp), o_map),
            scratch_shapes=[
                pltpu.VMEM((TB, 1, D), jnp.float32),  # masked-sum accumulator
                pltpu.VMEM((TB, 1, 1), jnp.float32),  # mask-count accumulator
            ],
        ),
        compiler_params=pltpu.CompilerParams(
            dimension_semantics=("parallel", "arbitrary"),
            vmem_limit_bytes=vmem_limit,
        ),
        cost_estimate=cost,
    )(nv, x, mask3d, w_p, b_p)

    return out[:B, :C]


if __name__ == "__main__":
    # Small shapes consistent with the module's forward:
    #   x: [batch=2, seq=8, hidden=32], mask: [2, 8], classes=2
    B, S, D, C = 2, 8, 32, 2

    key = jax.random.PRNGKey(0)
    kx, kw, kb = jax.random.split(key, 3)

    x = jax.random.normal(kx, (B, S, D), dtype=jnp.float32)
    # attention mask: first tokens valid, rest padded (deterministic pattern)
    valid_lens = jnp.array([6, 4], dtype=jnp.int32)
    mask = (jnp.arange(S)[None, :] < valid_lens[:, None]).astype(jnp.float32)

    # Deterministic parameters (nn.Linear(input_dim=D, num_classes=C)),
    # stored transposed: weight [D, C], bias [C].
    weight = 0.02 * jax.random.normal(kw, (D, C), dtype=jnp.float32)
    bias = 0.01 * jax.random.normal(kb, (C,), dtype=jnp.float32)

    out = baseline_forward(x, mask, weight, bias)
    out = jax.block_until_ready(out)

    # Pure-JAX reference (same semantics as the torch forward, eval mode).
    m3 = mask[:, :, None]
    avg_ref = (x * m3).sum(axis=1) / m3.sum(axis=1)
    ref = avg_ref @ weight + bias

    assert out.shape == (B, C), f"bad shape {out.shape}"
    assert jnp.allclose(out, ref, atol=1e-4, rtol=1e-4), "mismatch vs reference"

    print("KERNEL_OK")
</pallas_src>

<mosaic_0001>
module attributes {stable_mosaic.version = 11 : i64} {
  func.func @_baseline_kernel(%arg0: i32, %arg1: i32, %arg2: memref<1xi32, #tpu.memory_space<smem>>, %arg3: memref<8x8x32xf32, #tpu.memory_space<vmem>>, %arg4: memref<8x1x8xf32, #tpu.memory_space<vmem>>, %arg5: memref<32x128xf32, #tpu.memory_space<vmem>>, %arg6: memref<1x128xf32, #tpu.memory_space<vmem>>, %arg7: memref<8x128xf32, #tpu.memory_space<vmem>>, %arg8: memref<8x1x32xf32, #tpu.memory_space<vmem>>, %arg9: memref<8x1x1xf32, #tpu.memory_space<vmem>>) attributes {dimension_semantics = [#tpu.dimension_semantics<parallel>, #tpu.dimension_semantics<arbitrary>], iteration_bounds = array<i64: 1, 1>, scalar_prefetch = 1 : i64, scratch_operands = 2 : i64, tpu.core_type = #tpu.core_type<tc>, window_params = [{transform_indices = @transform_0, window_bounds = array<i64: 8, 8, 32>}, {transform_indices = @transform_1, window_bounds = array<i64: 8, 1, 8>}, {pipeline_mode = #tpu.pipeline_mode<synchronous>, transform_indices = @transform_2, window_bounds = array<i64: 32, 128>}, {pipeline_mode = #tpu.pipeline_mode<synchronous>, transform_indices = @transform_3, window_bounds = array<i64: 1, 128>}, {transform_indices = @transform_4, window_bounds = array<i64: 8, 128>}]} {
    %c0_i32 = arith.constant 0 : i32
    %0 = arith.cmpi eq, %arg1, %c0_i32 : i32
    %1 = arith.extui %0 : i1 to i32
    %c0_i32_0 = arith.constant 0 : i32
    %2 = arith.cmpi ne, %1, %c0_i32_0 : i32
    scf.if %2 {
      %cst = arith.constant 0.000000e+00 : f32
      %11 = vector.broadcast %cst : f32 to vector<8x1x32xf32>
      %c0 = arith.constant 0 : index
      %c0_4 = arith.constant 0 : index
      %c0_5 = arith.constant 0 : index
      %12 = vector.load %arg8[%c0, %c0_4, %c0_5] : memref<8x1x32xf32, #tpu.memory_space<vmem>>, vector<8x1x32xf32>
      tpu.vector_store %arg8[%c0, %c0_4, %c0_5], %11 {strides = array<i32>} : memref<8x1x32xf32, #tpu.memory_space<vmem>>, vector<8x1x32xf32>,
      %cst_6 = arith.constant 0.000000e+00 : f32
      %13 = vector.broadcast %cst_6 : f32 to vector<8x1x1xf32>
      %c0_7 = arith.constant 0 : index
      %c0_8 = arith.constant 0 : index
      %c0_9 = arith.constant 0 : index
      %14 = vector.load %arg9[%c0_7, %c0_8, %c0_9] : memref<8x1x1xf32, #tpu.memory_space<vmem>>, vector<8x1x1xf32>
      tpu.vector_store %arg9[%c0_7, %c0_8, %c0_9], %13 {strides = array<i32>} : memref<8x1x1xf32, #tpu.memory_space<vmem>>, vector<8x1x1xf32>,
    } else {
    }
    %3 = arith.index_cast %arg0 : i32 to index
    %4 = memref.load %arg2[%3] : memref<1xi32, #tpu.memory_space<smem>>
    %5 = arith.cmpi slt, %arg1, %4 : i32
    %6 = arith.extui %5 : i1 to i32
    %c0_i32_1 = arith.constant 0 : i32
    %7 = arith.cmpi ne, %6, %c0_i32_1 : i32
    scf.if %7 {
      %c0 = arith.constant 0 : index
      %c0_4 = arith.constant 0 : index
      %c0_5 = arith.constant 0 : index
      %11 = vector.load %arg3[%c0, %c0_4, %c0_5] : memref<8x8x32xf32, #tpu.memory_space<vmem>>, vector<8x8x32xf32>
      %c0_6 = arith.constant 0 : index
      %c0_7 = arith.constant 0 : index
      %c0_8 = arith.constant 0 : index
      %12 = vector.load %arg4[%c0_6, %c0_7, %c0_8] : memref<8x1x8xf32, #tpu.memory_space<vmem>>, vector<8x1x8xf32>
      %c0_9 = arith.constant 0 : index
      %c0_10 = arith.constant 0 : index
      %c0_11 = arith.constant 0 : index
      %13 = vector.load %arg8[%c0_9, %c0_10, %c0_11] : memref<8x1x32xf32, #tpu.memory_space<vmem>>, vector<8x1x32xf32>
      "tpu.trace_start"() <{level = 10 : i32, message = "bms,bsd->bmd"}> : () -> ()
      %cst = arith.constant dense<0.000000e+00> : vector<8x1x32xf32>
      %14 = tpu.matmul %12, %11, %cst {dimension_numbers = #tpu.dot_dimension_numbers<[2], [1], [1], [2], [0, 0, 0, 1, 1, 2], [0], [0]>} : vector<8x1x8xf32>, vector<8x8x32xf32>, vector<8x1x32xf32> -> vector<8x1x32xf32>
      "tpu.trace_stop"() : () -> ()
      %15 = arith.addf %13, %14 : vector<8x1x32xf32>
      %c0_12 = arith.constant 0 : index
      %c0_13 = arith.constant 0 : index
      %c0_14 = arith.constant 0 : index
      %16 = vector.load %arg8[%c0_12, %c0_13, %c0_14] : memref<8x1x32xf32, #tpu.memory_space<vmem>>, vector<8x1x32xf32>
      tpu.vector_store %arg8[%c0_12, %c0_13, %c0_14], %15 {strides = array<i32>} : memref<8x1x32xf32, #tpu.memory_space<vmem>>, vector<8x1x32xf32>,
      %c0_15 = arith.constant 0 : index
      %c0_16 = arith.constant 0 : index
      %c0_17 = arith.constant 0 : index
      %17 = vector.load %arg9[%c0_15, %c0_16, %c0_17] : memref<8x1x1xf32, #tpu.memory_space<vmem>>, vector<8x1x1xf32>
      %cst_18 = arith.constant dense<0.000000e+00> : vector<8x1xf32>
      %18 = vector.multi_reduction <add>, %12, %cst_18 [2] : vector<8x1x8xf32> to vector<8x1xf32>
      %19 = vector.shape_cast %18 : vector<8x1xf32> to vector<8x1x1xf32>
      %20 = arith.addf %17, %19 : vector<8x1x1xf32>
      %c0_19 = arith.constant 0 : index
      %c0_20 = arith.constant 0 : index
      %c0_21 = arith.constant 0 : index
      %21 = vector.load %arg9[%c0_19, %c0_20, %c0_21] : memref<8x1x1xf32, #tpu.memory_space<vmem>>, vector<8x1x1xf32>
      tpu.vector_store %arg9[%c0_19, %c0_20, %c0_21], %20 {strides = array<i32>} : memref<8x1x1xf32, #tpu.memory_space<vmem>>, vector<8x1x1xf32>,
    } else {
    }
    %c0_i32_2 = arith.constant 0 : i32
    %8 = arith.cmpi eq, %arg1, %c0_i32_2 : i32
    %9 = arith.extui %8 : i1 to i32
    %c0_i32_3 = arith.constant 0 : i32
    %10 = arith.cmpi ne, %9, %c0_i32_3 : i32
    scf.if %10 {
      %c0 = arith.constant 0 : index
      %c0_4 = arith.constant 0 : index
      %c0_5 = arith.constant 0 : index
      %11 = vector.load %arg8[%c0, %c0_4, %c0_5] : memref<8x1x32xf32, #tpu.memory_space<vmem>>, vector<8x1x32xf32>
      %12 = vector.shape_cast %11 : vector<8x1x32xf32> to vector<8x32xf32>
      %c0_6 = arith.constant 0 : index
      %c0_7 = arith.constant 0 : index
      %c0_8 = arith.constant 0 : index
      %13 = vector.load %arg9[%c0_6, %c0_7, %c0_8] : memref<8x1x1xf32, #tpu.memory_space<vmem>>, vector<8x1x1xf32>
      %14 = vector.shape_cast %13 : vector<8x1x1xf32> to vector<8x1xf32>
      %15 = tpu.reciprocal %14 : vector<8x1xf32> -> vector<8x1xf32>
      %16 = vector.broadcast %15 : vector<8x1xf32> to vector<8x32xf32>
      %17 = arith.mulf %12, %16 : vector<8x32xf32>
      %c0_9 = arith.constant 0 : index
      %c0_10 = arith.constant 0 : index
      %18 = vector.load %arg5[%c0_9, %c0_10] : memref<32x128xf32, #tpu.memory_space<vmem>>, vector<32x128xf32>
      %cst = arith.constant dense<0.000000e+00> : vector<8x128xf32>
      %19 = tpu.matmul %17, %18, %cst {dimension_numbers = #tpu.dot_dimension_numbers<[1], [0], [0], [1], [0, 0, 1, 1], [], []>} : vector<8x32xf32>, vector<32x128xf32>, vector<8x128xf32> -> vector<8x128xf32>
      %c0_11 = arith.constant 0 : index
      %c0_12 = arith.constant 0 : index
      %20 = vector.load %arg6[%c0_11, %c0_12] : memref<1x128xf32, #tpu.memory_space<vmem>>, vector<1x128xf32>
      %21 = vector.broadcast %20 : vector<1x128xf32> to vector<8x128xf32>
      %22 = arith.addf %19, %21 : vector<8x128xf32>
      %c0_13 = arith.constant 0 : index
      %c0_14 = arith.constant 0 : index
      %23 = vector.load %arg7[%c0_13, %c0_14] : memref<8x128xf32, #tpu.memory_space<vmem>>, vector<8x128xf32>
      tpu.vector_store %arg7[%c0_13, %c0_14], %22 {strides = array<i32>} : memref<8x128xf32, #tpu.memory_space<vmem>>, vector<8x128xf32>,
    } else {
    }
    return
  }
  func.func @transform_0(%arg0: i32, %arg1: i32, %arg2: memref<1xi32, #tpu.memory_space<smem>>) -> (i32, i32, i32) {
    %0 = arith.index_cast %arg0 : i32 to index
    %1 = memref.load %arg2[%0] : memref<1xi32, #tpu.memory_space<smem>>
    %c1_i32 = arith.constant 1 : i32
    %2 = arith.subi %1, %c1_i32 : i32
    %c0_i32 = arith.constant 0 : i32
    %3 = arith.maxsi %2, %c0_i32 : i32
    %4 = arith.minsi %arg1, %3 : i32
    %c0_i32_0 = arith.constant 0 : i32
    %c0_i32_1 = arith.constant 0 : i32
    return %arg0, %4, %c0_i32_0 : i32, i32, i32
  }
  func.func @transform_1(%arg0: i32, %arg1: i32, %arg2: memref<1xi32, #tpu.memory_space<smem>>) -> (i32, i32, i32) {
    %0 = arith.index_cast %arg0 : i32 to index
    %1 = memref.load %arg2[%0] : memref<1xi32, #tpu.memory_space<smem>>
    %c1_i32 = arith.constant 1 : i32
    %2 = arith.subi %1, %c1_i32 : i32
    %c0_i32 = arith.constant 0 : i32
    %3 = arith.maxsi %2, %c0_i32 : i32
    %4 = arith.minsi %arg1, %3 : i32
    %c0_i32_0 = arith.constant 0 : i32
    %c0_i32_1 = arith.constant 0 : i32
    return %arg0, %c0_i32_0, %4 : i32, i32, i32
  }
  func.func @transform_2(%arg0: i32, %arg1: i32, %arg2: memref<1xi32, #tpu.memory_space<smem>>) -> (i32, i32) {
    %c0_i32 = arith.constant 0 : i32
    %c0_i32_0 = arith.constant 0 : i32
    %c0_i32_1 = arith.constant 0 : i32
    return %c0_i32, %c0_i32_0 : i32, i32
  }
  func.func @transform_3(%arg0: i32, %arg1: i32, %arg2: memref<1xi32, #tpu.memory_space<smem>>) -> (i32, i32) {
    %c0_i32 = arith.constant 0 : i32
    %c0_i32_0 = arith.constant 0 : i32
    %c0_i32_1 = arith.constant 0 : i32
    return %c0_i32, %c0_i32_0 : i32, i32
  }
  func.func @transform_4(%arg0: i32, %arg1: i32, %arg2: memref<1xi32, #tpu.memory_space<smem>>) -> (i32, i32) {
    %c0_i32 = arith.constant 0 : i32
    %c0_i32_0 = arith.constant 0 : i32
    return %arg0, %c0_i32 : i32, i32
  }
}

</mosaic_0001>

<bundles_post_ra>
// kernel: tpu_custom_call.1
= control target key start
LH: loop header
LB: loop body
LE: loop exit
PB: predicated region body
PF: predicated region fallthrough
CT: control target
= control target key end

     0   :  { %11 = vsyncpa [#allocation7], 0  ;;  %s1083_s0 = inlined_call_operand.<no memory space> [shape: s32[1], index: 0, kind: input, shape index: {}]   ;;  %s1084_s1 = inlined_call_operand.hbm [shape: f32[8,8,32], index: 1, kind: input, shape index: {}]   ;;  %s1085_s2 = inlined_call_operand.hbm [shape: f32[8,1,8], index: 2, kind: input, shape index: {}]   ;;  %s1086_s3 = inlined_call_operand.hbm [shape: f32[32,128], index: 3, kind: input, shape index: {}]   ;;  %s1087_s4 = inlined_call_operand.vmem [shape: f32[1,128], index: 4, kind: input, shape index: {}]   ;;  %s1088_s5 = inlined_call_operand.hbm [shape: f32[8,128], index: 5, kind: output, shape index: {}]  }
   0x1   :  { %12 = vsyncpa [#allocation10], 0  ;;  %s661_s20 = sadd.s32 4294967295, %s1083_s0 }
   0x2   :  { %13 = vsyncpa [#allocation8], 0  ;;  %p18_p0 = scmp.gt.s32.totalorder %s661_s20, 0  ;;  %s815_s21 = smov [#allocation9]  }
   0x3   :  { %s48_s22 = sshll.u32 %s815_s21, 4  ;;  %s816_s23 = smov [#allocation6]   ;;  %s49_s22 = int_to_ptr.vmem [resolvable:$true] %s48_s22 }
   0x4   :  { %s1112_s20 = smov (!%p18_p0, %s661_s20), 0  ;;  %s858_s24 = sshll.u32 %s816_s23, 4  ;;  %s29_s24 = int_to_ptr.vmem [resolvable:$true] %s858_s24 }
   0x5   :  { %s1114_s20 = smov (%p18_p0, %s1112_s20), 0  ;;  %s717_s13 = scalar_lea.hbm %s1085_s2, 8 }
   0x6   :  { %s45_s27 = scalar_lea.hbm %s1085_s2, %s1114_s20  ;;  %s663_s28 = sshll.u32 %s1114_s20, 3 }
   0x7   :  { %s46_s29 = sshll.u32 %s45_s27, 4  ;;  %s25_s7 = scalar_lea.hbm %s1084_s1, %s663_s28  ;;  %s47_s29 = int_to_ptr.hbm [resolvable:$true] %s46_s29 }
   0x8   :  { %s26_s8 = sshll.u32 %s25_s7, 4  ;;  %s713_s9 = sshra.s32 %s47_s29, 4  ;;  %s714_s9 = int_to_ptr.hbm [resolvable:$true] %s713_s9  ;;  %s27_s8 = int_to_ptr.hbm [resolvable:$true] %s26_s8 }
   0x9   :  { %s715_s10 = scalar_lea.hbm %s714_s9, 8  ;;  %p718_p2 = scmp.lt.s32.totalorder %s714_s9, %s1085_s2 }
   0xa   :  { %p716_p1 = scmp.ne.s32.totalorder %s714_s9, %s715_s10  ;;  %p719_p3 = scmp.lt.s32.totalorder %s717_s13, %s715_s10 }
   0xc   :  { %p720_p4 = por %p719_p3, %p718_p2 }
   0xe   :  { %p721_p5 = pnand %p720_p4, %p716_p1 }
  0x10   :  { %724 = shalt.err (!%p721_p5)
}
  0x11   :  { %s817_s16 = smov 16   ;;  %s818_s17 = smov 1  }
  0x12   :  { %54 = dma.hbm_to_vmem [thread:$0]  %s47_s29, 128, %s49_s22, [#allocation10], %s817_s16, %s817_s16, %s818_s17  }
  0x13   :  { %s59_s20 = sshll.u32 %s1086_s3, 4  ;;  %s737_s21 = sshra.s32 %s27_s8, 4  ;;  %s738_s21 = int_to_ptr.hbm [resolvable:$true] %s737_s21  ;;  %s60_s20 = int_to_ptr.hbm [resolvable:$true] %s59_s20 }
  0x14   :  { %s739_s23 = scalar_lea.hbm %s738_s21, 64  ;;  %s741_s26 = scalar_lea.hbm %s1084_s1, 64 }
  0x15   :  { %p740_p6 = scmp.ne.s32.totalorder %s738_s21, %s739_s23  ;;  %p742_p7 = scmp.lt.s32.totalorder %s738_s21, %s1084_s1 }
  0x16   :  { %p743_p8 = scmp.lt.s32.totalorder %s741_s26, %s739_s23 }
  0x18   :  { %p744_p9 = por %p743_p8, %p742_p7 }
  0x1a   :  { %p745_p10 = pnand %p744_p9, %p740_p6 }
  0x1c   :  { %748 = shalt.err (!%p745_p10)
}
  0x1d   :  { %s819_s22 = smov 128   ;;  %s820_s29 = smov 8  }
  0x1e   :  { %34 = dma.hbm_to_vmem [thread:$0]  %s27_s8, 1024, %s29_s24, [#allocation7], %s819_s22, %s819_s22, %s820_s29  }
  0x1f   :  { %s821_s3 = smov [#allocation11]  }
  0x20   :  { %s61_s30 = sshll.u32 %s821_s3, 4  ;;  %s62_s30 = int_to_ptr.vmem [resolvable:$true] %s61_s30 }
  0x21   :  { %67 = dma.hbm_to_vmem [thread:$0]  %s60_s20, 512, %s62_s30, [#allocation10], %s819_s22, %s819_s22, %s820_s29  }
  0x22   :  { %809 = dma.done.wait [#allocation7], 1024  }
  0x23   :  { %810 = vsyncadd [#allocation7], 4294966272 }
  0x24   :  { %811 = dma.done.wait [#allocation10], 640  }
  0x25   :  { %812 = vsyncadd [#allocation10], 4294966656  ;;  %vm98_vm0 = vcmask 253952   ;;  %v822_v0 = vmov 0.0   ;;  %vm107_vm1 = vcmask 0   ;;  %p667_p11 = scmp.le.s32.totalorder %s1083_s0, 0 }
  0x26   :  { %99 = vst.msk [vmem:[#allocation2] sm:$0x1] %vm98_vm0, %v822_v0 }
  0x27   :  { %100 = vst.msk [vmem:[#allocation2 + $0x1] sm:$0x1] %vm98_vm0, %v822_v0 }
  0x28   :  { %101 = vst.msk [vmem:[#allocation2 + $0x2] sm:$0x1] %vm98_vm0, %v822_v0 }
  0x29   :  { %102 = vst.msk [vmem:[#allocation2 + $0x3] sm:$0x1] %vm98_vm0, %v822_v0 }
  0x2a   :  { %103 = vst.msk [vmem:[#allocation2 + $0x4] sm:$0x1] %vm98_vm0, %v822_v0 }
  0x2b   :  { %104 = vst.msk [vmem:[#allocation2 + $0x5] sm:$0x1] %vm98_vm0, %v822_v0 }
  0x2c   :  { %105 = vst.msk [vmem:[#allocation2 + $0x6] sm:$0x1] %vm98_vm0, %v822_v0 }
  0x2d   :  { %106 = vst.msk [vmem:[#allocation2 + $0x7] sm:$0x1] %vm98_vm0, %v822_v0 }
  0x2e   :  { %108 = vst.msk [vmem:[#allocation3] sm:$0x1] %vm107_vm1, %v822_v0 }
  0x2f   :  { %109 = vst.msk [vmem:[#allocation3 + $0x1] sm:$0x1] %vm107_vm1, %v822_v0 }
  0x30   :  { %110 = vst.msk [vmem:[#allocation3 + $0x2] sm:$0x1] %vm107_vm1, %v822_v0 }
  0x31   :  { %111 = vst.msk [vmem:[#allocation3 + $0x3] sm:$0x1] %vm107_vm1, %v822_v0  ;;  %120 = sbr.rel (%p667_p11) target bundleno = 201 (0xc9), region = 37 }
  0x32   :  { %112 = vst.msk [vmem:[#allocation3 + $0x4] sm:$0x1] %vm107_vm1, %v822_v0 }
  0x33   :  { %113 = vst.msk [vmem:[#allocation3 + $0x5] sm:$0x1] %vm107_vm1, %v822_v0 }
  0x34   :  { %114 = vst.msk [vmem:[#allocation3 + $0x6] sm:$0x1] %vm107_vm1, %v822_v0 }
  0x35   :  { %115 = vst.msk [vmem:[#allocation3 + $0x7] sm:$0x1] %vm107_vm1, %v822_v0 }
  0x36   :  { %v123_v1 = vld [vmem:[#allocation6 + $0x10] sm:$0xff]  ;;  %v124_v2 = vld [vmem:[#allocation6 + $0x18] sm:$0xff]  ;;  %v131_v3 = vld [vmem:[#allocation9 + $0x2] sm:$0x1]  ;;  %vm145_vm2 = vcmask 64512   ;;  %vm355_vm3 = vcmask 57344  }
  0x37   :  { %210 = vmatpush.msra.mxu2 %v123_v1  ;;  %233 = vmatpush.msra.mxu3 %v124_v2  ;;  %v132_v4 = vld [vmem:[#allocation9 + $0x3] sm:$0x1]  ;;  %v127_v5 = vld [vmem:[#allocation6 + $0x30] sm:$0xff]  ;;  %v128_v6 = vld [vmem:[#allocation6 + $0x38] sm:$0xff]  ;;  %v362_v13 = vsel %vm355_vm3, %v131_v3, 0.0 }
  0x38   :  { %670 = vmatmul.msk.f32.vlgmr.msra.gmra.mxu2 %vm145_vm2, %v131_v3  ;;  %671 = vmatmul.msk.f32.vlgmr.msra.gmra.mxu3 %vm145_vm2, %v132_v4  ;;  %v121_v7 = vld [vmem:[#allocation6] sm:$0xff]  ;;  %v122_v8 = vld [vmem:[#allocation6 + $0x8] sm:$0xff]  ;;  %v365_v20 = vsel %vm355_vm3, %v132_v4, 0.0  ;;  %v349_v25 = vld [vmem:[#allocation3 + $0x2] sm:$0x1] }
  0x39   :  { %v129_v9 = vld [vmem:[#allocation9] sm:$0x1]  ;;  %302 = vmatpush.msrb.mxu2 %v127_v5  ;;  %325 = vmatpush.msrb.mxu3 %v128_v6  ;;  %v130_v10 = vld [vmem:[#allocation9 + $0x1] sm:$0x1]  ;;  %v126_v12 = vld [vmem:[#allocation6 + $0x28] sm:$0xff] }
  0x3a   :  { %v125_v11 = vld [vmem:[#allocation6 + $0x20] sm:$0xff]  ;;  %164 = vmatpush.msra.mxu0 %v121_v7  ;;  %187 = vmatpush.msra.mxu1 %v122_v8  ;;  %v356_v14 = vsel %vm355_vm3, %v129_v9, 0.0  ;;  %v359_v21 = vsel %vm355_vm3, %v130_v10, 0.0  ;;  %v347_v26 = vld [vmem:[#allocation3] sm:$0x1] }
  0x3b   :  { %v133_v15 = vld [vmem:[#allocation9 + $0x4] sm:$0x1]  ;;  %668 = vmatmul.msk.f32.vlgmr.msra.gmra.mxu0 %vm145_vm2, %v129_v9  ;;  %669 = vmatmul.msk.f32.vlgmr.msra.gmra.mxu1 %vm145_vm2, %v130_v10  ;;  %v135_v17 = vld [vmem:[#allocation9 + $0x6] sm:$0x1]  ;;  %v136_v18 = vld [vmem:[#allocation9 + $0x7] sm:$0x1] }
  0x3c   :  { %v368_v16 = vsel %vm355_vm3, %v133_v15, 0.0  ;;  %256 = vmatpush.msrb.mxu0 %v125_v11  ;;  %279 = vmatpush.msrb.mxu1 %v126_v12  ;;  %v134_v19 = vld [vmem:[#allocation9 + $0x5] sm:$0x1]  ;;  %v377_v23 = vsel %vm355_vm3, %v136_v18, 0.0  ;;  %v374_v24 = vsel %vm355_vm3, %v135_v17, 0.0 }
  0x3d   :  { %363 = vadd.xlane.f32.xlu1 %v362_v13  ;;  %357 = vadd.xlane.f32.xlu0 %v356_v14  ;;  %v371_v22 = vsel %vm355_vm3, %v134_v19, 0.0  ;;  %v351_v27 = vld [vmem:[#allocation3 + $0x4] sm:$0x1]  ;;  %v350_v34 = vld [vmem:[#allocation3 + $0x3] sm:$0x1] }
  0x3e   :  { %369 = vadd.xlane.f32.xlu2 %v368_v16  ;;  %v348_v35 = vld [vmem:[#allocation3 + $0x1] sm:$0x1]  ;;  %v137_v36 = vld [vmem:[#allocation2] sm:$0x1]  ;;  %v138_v37 = vld [vmem:[#allocation2 + $0x1] sm:$0x1] }
  0x3f   :  { %v139_v44 = vld [vmem:[#allocation2 + $0x2] sm:$0x1]  ;;  %v140_v45 = vld [vmem:[#allocation2 + $0x3] sm:$0x1]  ;;  %v352_v48 = vld [vmem:[#allocation3 + $0x5] sm:$0x1] }
  0x40   :  { %674 = vmatmul.msk.f32.vlgmr.msrb.gmra.mxu2 %vm145_vm2, %v135_v17  ;;  %675 = vmatmul.msk.f32.vlgmr.msrb.gmra.mxu3 %vm145_vm2, %v136_v18  ;;  %v354_v55 = vld [vmem:[#allocation3 + $0x7] sm:$0x1]  ;;  %v353_v56 = vld [vmem:[#allocation3 + $0x6] sm:$0x1]  ;;  %v141_v57 = vld [vmem:[#allocation2 + $0x4] sm:$0x1] }
  0x41   :  { %v142_v58 = vld [vmem:[#allocation2 + $0x5] sm:$0x1]  ;;  %v143_v1 = vld [vmem:[#allocation2 + $0x6] sm:$0x1]  ;;  %v144_v2 = vld [vmem:[#allocation2 + $0x7] sm:$0x1] }
  0x43   :  { %672 = vmatmul.msk.f32.vlgmr.msrb.gmra.mxu0 %vm145_vm2, %v133_v15  ;;  %673 = vmatmul.msk.f32.vlgmr.msrb.gmra.mxu1 %vm145_vm2, %v134_v19 }
  0x45   :  { %366 = vadd.xlane.f32.xlu1 %v365_v20  ;;  %360 = vadd.xlane.f32.xlu0 %v359_v21 }
  0x46   :  { %372 = vadd.xlane.f32.xlu2 %v371_v22 }
  0x4d   :  { %378 = vadd.xlane.f32.xlu1 %v377_v23  ;;  %375 = vadd.xlane.f32.xlu0 %v374_v24 }
  0xb0   :  { %v364_v28 = vpop.xlane.xlu1 %363  ;;  %v358_v29 = vpop.xlane.xlu0 %357 }
  0xb1   :  { %v382_v30 = vadd.f32 %v364_v28, %v349_v25  ;;  %v380_v31 = vadd.f32 %v358_v29, %v347_v26  ;;  %v370_v32 = vpop.xlane.xlu2 %369 }
  0xb2   :  { %v384_v33 = vadd.f32 %v370_v32, %v351_v27 }
  0xb3   :  { %391 = vst.msk [vmem:[#allocation3 + $0x2] sm:$0x1] %vm107_vm1, %v382_v30 }
  0xb4   :  { %389 = vst.msk [vmem:[#allocation3] sm:$0x1] %vm107_vm1, %v380_v31 }
  0xb5   :  { %393 = vst.msk [vmem:[#allocation3 + $0x4] sm:$0x1] %vm107_vm1, %v384_v33 }
  0xb8   :  { %v367_v38 = vpop.xlane.xlu1 %366  ;;  %v361_v39 = vpop.xlane.xlu0 %360 }
  0xb9   :  { %v383_v40 = vadd.f32 %v367_v38, %v350_v34  ;;  %v381_v41 = vadd.f32 %v361_v39, %v348_v35  ;;  %v166_v42 = vpop.f32.mrf.mxu0  ;;  %v189_v43 = vpop.f32.mrf.mxu1 }
  0xba   :  { %v330_v46 = vadd.f32 %v166_v42, %v137_v36  ;;  %v331_v47 = vadd.f32 %v189_v43, %v138_v37  ;;  %v373_v49 = vpop.xlane.xlu2 %372 }
  0xbb   :  { %392 = vst.msk [vmem:[#allocation3 + $0x3] sm:$0x1] %vm107_vm1, %v383_v40  ;;  %v212_v50 = vpop.f32.mrf.mxu2  ;;  %v235_v51 = vpop.f32.mrf.mxu3  ;;  %v385_v54 = vadd.f32 %v373_v49, %v352_v48 }
  0xbc   :  { %390 = vst.msk [vmem:[#allocation3 + $0x1] sm:$0x1] %vm107_vm1, %v381_v41  ;;  %v332_v52 = vadd.f32 %v212_v50, %v139_v44  ;;  %v333_v53 = vadd.f32 %v235_v51, %v140_v45 }
  0xbd   :  { %339 = vst.msk [vmem:[#allocation2] sm:$0x1] %vm98_vm0, %v330_v46 }
  0xbe   :  { %340 = vst.msk [vmem:[#allocation2 + $0x1] sm:$0x1] %vm98_vm0, %v331_v47 }
  0xbf   :  { %341 = vst.msk [vmem:[#allocation2 + $0x2] sm:$0x1] %vm98_vm0, %v332_v52 }
  0xc0   :  { %342 = vst.msk [vmem:[#allocation2 + $0x3] sm:$0x1] %vm98_vm0, %v333_v53  ;;  %v379_v59 = vpop.xlane.xlu1 %378  ;;  %v376_v60 = vpop.xlane.xlu0 %375 }
  0xc1   :  { %394 = vst.msk [vmem:[#allocation3 + $0x5] sm:$0x1] %vm107_vm1, %v385_v54  ;;  %v387_v61 = vadd.f32 %v379_v59, %v354_v55  ;;  %v386_v62 = vadd.f32 %v376_v60, %v353_v56  ;;  %v258_v63 = vpop.f32.mrf.mxu0  ;;  %v281_v0 = vpop.f32.mrf.mxu1 }
  0xc2   :  { %v334_v3 = vadd.f32 %v258_v63, %v141_v57  ;;  %v335_v4 = vadd.f32 %v281_v0, %v142_v58 }
  0xc3   :  { %396 = vst.msk [vmem:[#allocation3 + $0x7] sm:$0x1] %vm107_vm1, %v387_v61  ;;  %v304_v5 = vpop.f32.mrf.mxu2  ;;  %v327_v6 = vpop.f32.mrf.mxu3 }
  0xc4   :  { %395 = vst.msk [vmem:[#allocation3 + $0x6] sm:$0x1] %vm107_vm1, %v386_v62  ;;  %v336_v7 = vadd.f32 %v304_v5, %v143_v1  ;;  %v337_v8 = vadd.f32 %v327_v6, %v144_v2 }
  0xc5   :  { %343 = vst.msk [vmem:[#allocation2 + $0x4] sm:$0x1] %vm98_vm0, %v334_v3 }
  0xc6   :  { %344 = vst.msk [vmem:[#allocation2 + $0x5] sm:$0x1] %vm98_vm0, %v335_v4 }
  0xc7   :  { %345 = vst.msk [vmem:[#allocation2 + $0x6] sm:$0x1] %vm98_vm0, %v336_v7 }
  0xc8   :  { %346 = vst.msk [vmem:[#allocation2 + $0x7] sm:$0x1] %vm98_vm0, %v337_v8 }
  0xc9 PF:  { %v408_v10 = vld [vmem:[#allocation3] sm:$0x1]  ;;  %v823_v11 = vmov 0   ;;  %v935_v13 = vld [vmem:[#allocation3 + $0x1] sm:$0x1]  ;;  %s824_s7 = smov [#allocation12]  }
  0xca   :  { %v410_v9 = vld [vmem:[#allocation3 + $0x2] sm:$0x1]  ;;  %694 = vset.pattern.permute.xlu1 %v823_v11  ;;  %693 = vset.pattern.permute.xlu0 %v823_v11  ;;  %v425_v17 = vand.u32 2147483647, %v408_v10  ;;  %v427_v18 = vand.u32 2147483648, %v408_v10  ;;  %vm421_vm6 = vweird.f32 %v408_v10  ;;  %vm435_vm11 = vweird.f32 %v935_v13  ;;  %s645_s8 = sshll.u32 %s824_s7, 4  ;;  %s646_s8 = int_to_ptr.vmem [resolvable:$true] %s645_s8 }
  0xcb   :  { %697 = vrcp.f32 %v410_v9  ;;  %v933_v12 = vld [vmem:[#allocation3 + $0x3] sm:$0x1]  ;;  %695 = vset.pattern.permute.xlu2 %v823_v11  ;;  %v453_v14 = vand.u32 2147483647, %v410_v9  ;;  %v455_v16 = vand.u32 2147483648, %v410_v9  ;;  %vm449_vm4 = vweird.f32 %v410_v9  ;;  %s647_s11 = sshll.u32 %s1088_s5, 4  ;;  %s648_s11 = int_to_ptr.hbm [resolvable:$true] %s647_s11 }
  0xcc   :  { %699 = vrcp.f32 %v408_v10  ;;  %vm463_vm7 = vweird.f32 %v933_v12  ;;  %v950_v25 = vld [vmem:[#allocation3 + $0x4] sm:$0x1]  ;;  %vm954_vm8 = vcmp.eq.f32.partialorder %v425_v17, 8.507059e+37  ;;  %v428_v29 = vor.u32 1.1754944e-38, %v427_v18  ;;  %v400_v61 = vld [vmem:[#allocation2] sm:$0x1] }
  0xcd   :  { %701 = vrcp.f32 %v933_v12  ;;  %vm944_vm5 = vcmp.eq.f32.partialorder %v453_v14, 8.507059e+37  ;;  %v456_v24 = vor.u32 1.1754944e-38, %v455_v16  ;;  %v467_v30 = vand.u32 2147483647, %v933_v12  ;;  %v413_v4 = vld [vmem:[#allocation3 + $0x5] sm:$0x1] }
  0xce   :  { %703 = vrcp.f32 %v935_v13  ;;  %v941_v19 = vld [vmem:[#allocation3 + $0x6] sm:$0x1]  ;;  %v469_v33 = vand.u32 2147483648, %v933_v12  ;;  %v439_v40 = vand.u32 2147483647, %v935_v13  ;;  %v441_v44 = vand.u32 2147483648, %v935_v13 }
  0xcf   :  { %v938_v15 = vld [vmem:[#allocation3 + $0x7] sm:$0x1]  ;;  %vm976_vm13 = vcmp.eq.f32.partialorder %v467_v30, 8.507059e+37  ;;  %v481_v7 = vand.u32 2147483647, %v950_v25  ;;  %v511_v18 = vand.u32 2147483648, %v941_v19 }
  0xd0   :  { %705 = vrcp.f32 %v938_v15  ;;  %v470_v56 = vor.u32 1.1754944e-38, %v469_v33  ;;  %vm519_vm2 = vweird.f32 %v938_v15  ;;  %v442_v5 = vor.u32 1.1754944e-38, %v441_v44  ;;  %v403_v2 = vld [vmem:[#allocation2 + $0x3] sm:$0x1] }
  0xd1   :  { %v698_v20 = vpop.eup %697  ;;  %707 = vrcp.f32 %v941_v19  ;;  %v525_v14 = vand.u32 2147483648, %v938_v15  ;;  %v512_v33 = vor.u32 1.1754944e-38, %v511_v18 }
  0xd2   :  { %v700_v22 = vpop.eup %699  ;;  %v445_v23 = vmul.f32 %v698_v20, %v410_v9  ;;  %vm450_vm9 = vweird.f32 %v698_v20  ;;  %709 = vrcp.f32 %v950_v25 }
  0xd3   :  { %v952_v26 = vpop.eup %701  ;;  %v417_v27 = vmul.f32 %v700_v22, %v408_v10  ;;  %vm422_vm10 = vweird.f32 %v700_v22  ;;  %vm972_vm12 = vmor %vm449_vm4, %vm450_vm9  ;;  %vm1022_vm4 = vcmp.eq.f32.partialorder %v439_v40, 8.507059e+37  ;;  %v483_v10 = vand.u32 2147483648, %v950_v25 }
  0xd4   :  { %v446_v31 = vsub.f32 1.0, %v445_v23  ;;  %v459_v32 = vmul.f32 %v952_v26, %v933_v12  ;;  %v962_v34 = vpop.eup %703  ;;  %vm987_vm14 = vmor %vm421_vm6, %vm422_vm10  ;;  %vm464_vm15 = vweird.f32 %v952_v26  ;;  %v523_v12 = vand.u32 2147483647, %v938_v15 }
  0xd5   :  { %v418_v35 = vsub.f32 1.0, %v417_v27  ;;  %v431_v39 = vmul.f32 %v962_v34, %v935_v13  ;;  %vm436_vm0 = vweird.f32 %v962_v34  ;;  %vm1006_vm1 = vmor %vm463_vm7, %vm464_vm15  ;;  %711 = vrcp.f32 %v413_v4 }
  0xd6   :  { %v966_v36 = vpop.eup %705  ;;  %v447_v37 = vmul.f32 %v698_v20, %v446_v31  ;;  %v460_v38 = vsub.f32 1.0, %v459_v32  ;;  %vm1018_vm3 = vmor %vm435_vm11, %vm436_vm0  ;;  %v484_v21 = vor.u32 1.1754944e-38, %v483_v10  ;;  %vm482_vm11 = vcmp.eq.f32.partialorder %v481_v7, 8.507059e+37  ;;  %v407_v10 = vld [vmem:[#allocation2 + $0x7] sm:$0x1] }
  0xd7   :  { %v419_v42 = vmul.f32 %v700_v22, %v418_v35  ;;  %v515_v45 = vmul.f32 %v966_v36, %v938_v15  ;;  %v983_v46 = vpop.eup %707  ;;  %v432_v50 = vsub.f32 1.0, %v431_v39  ;;  %vm520_vm7 = vweird.f32 %v966_v36 }
  0xd8   :  { %v448_v47 = vadd.f32 %v698_v20, %v447_v37  ;;  %v461_v49 = vmul.f32 %v952_v26, %v460_v38  ;;  %v501_v53 = vmul.f32 %v983_v46, %v941_v19  ;;  %v710_v58 = vpop.eup %709  ;;  %vm506_vm9 = vweird.f32 %v983_v46 }
  0xd9   :  { %v420_v51 = vadd.f32 %v700_v22, %v419_v42  ;;  %v516_v52 = vsub.f32 1.0, %v515_v45  ;;  %v433_v57 = vmul.f32 %v962_v34, %v432_v50  ;;  %v473_v3 = vmul.f32 %v710_v58, %v950_v25  ;;  %v586_v50 = vld [vmem:[#allocation11 + $0x10] sm:$0xff] }
  0xda   :  { %v452_v54 = vsel %vm972_vm12, %v698_v20, %v448_v47  ;;  %v462_v55 = vadd.f32 %v952_v26, %v461_v49  ;;  %v502_v62 = vsub.f32 1.0, %v501_v53  ;;  %vm478_vm6 = vweird.f32 %v710_v58  ;;  %vm1057_vm12 = vmor %vm519_vm2, %vm520_vm7  ;;  %v587_v49 = vld [vmem:[#allocation11 + $0x18] sm:$0xff]  ;;  %v696_v20 = vld [vmem:[%s1087_s4] ss:$0 sm:$0xff] }
  0xdb   :  { %v457_v59 = vsel %vm944_vm5, %v456_v24, %v452_v54  ;;  %v424_v60 = vsel %vm987_vm14, %v700_v22, %v420_v51  ;;  %v434_v0 = vadd.f32 %v962_v34, %v433_v57  ;;  %v517_v6 = vmul.f32 %v966_v36, %v516_v52  ;;  %v712_v30 = vpop.eup %711  ;;  %631 = vmatpush.msra.mxu0 %v587_v49  ;;  %v585_v51 = vld [vmem:[#allocation11 + $0x8] sm:$0xff]  ;;  %v584_v52 = vld [vmem:[#allocation11] sm:$0xff] }
  0xdc   :  { %542 = vperm.xlu1 %694, %v457_v59   ;;  %v429_v63 = vsel %vm954_vm8, %v428_v29, %v424_v60  ;;  %vm477_vm5 = vweird.f32 %v950_v25  ;;  %v466_v8 = vsel %vm1006_vm1, %v952_v26, %v462_v55  ;;  %v474_v9 = vsub.f32 1.0, %v473_v3  ;;  %v405_v54 = vld [vmem:[#allocation2 + $0x5] sm:$0x1] }
  0xdd   :  { %530 = vperm.xlu0 %693, %v429_v63   ;;  %v438_v11 = vsel %vm1018_vm3, %v962_v34, %v434_v0  ;;  %v503_v13 = vmul.f32 %v983_v46, %v502_v62  ;;  %vm505_vm8 = vweird.f32 %v941_v19  ;;  %v471_v17 = vsel %vm976_vm13, %v470_v56, %v466_v8  ;;  %vm1048_vm10 = vmor %vm477_vm5, %vm478_vm6  ;;  %632 = vmatpush.msra.mxu0 %v586_v50 }
  0xde   :  { %v475_v16 = vmul.f32 %v710_v58, %v474_v9  ;;  %v443_v22 = vsel %vm1022_vm4, %v442_v5, %v438_v11  ;;  %v518_v23 = vadd.f32 %v966_v36, %v517_v6  ;;  %v509_v27 = vand.u32 2147483647, %v941_v19  ;;  %vm1065_vm13 = vmor %vm505_vm8, %vm506_vm9  ;;  %v401_v5 = vld [vmem:[#allocation2 + $0x1] sm:$0x1] }
  0xdf   :  { %v504_v25 = vadd.f32 %v983_v46, %v503_v13  ;;  %v526_v15 = vor.u32 1.1754944e-38, %v525_v14  ;;  %vm524_vm14 = vcmp.eq.f32.partialorder %v523_v12, 8.507059e+37  ;;  %v487_v34 = vmul.f32 %v712_v30, %v413_v4  ;;  %633 = vmatpush.msra.mxu0 %v585_v51  ;;  %v406_v13 = vld [vmem:[#allocation2 + $0x6] sm:$0x1] }
  0xe0   :  { %v476_v24 = vadd.f32 %v710_v58, %v475_v16  ;;  %v522_v32 = vsel %vm1057_vm12, %v966_v36, %v518_v23  ;;  %vm510_vm15 = vcmp.eq.f32.partialorder %v509_v27, 8.507059e+37  ;;  %v497_v35 = vand.u32 2147483648, %v413_v4 }
  0xe1   :  { %v508_v19 = vsel %vm1065_vm13, %v983_v46, %v504_v25  ;;  %v488_v37 = vsub.f32 1.0, %v487_v34  ;;  %vm491_vm0 = vweird.f32 %v413_v4  ;;  %vm492_vm1 = vweird.f32 %v712_v30  ;;  %v404_v46 = vld [vmem:[#allocation2 + $0x4] sm:$0x1]  ;;  %634 = vmatpush.msra.mxu0 %v584_v52 }
  0xe2   :  { %v480_v29 = vsel %vm1048_vm10, %v710_v58, %v476_v24  ;;  %v495_v38 = vand.u32 2147483647, %v413_v4  ;;  %v527_v39 = vsel %vm524_vm14, %v526_v15, %v522_v32  ;;  %v513_v40 = vsel %vm510_vm15, %v512_v33, %v508_v19  ;;  %vm493_vm2 = vmor %vm491_vm0, %vm492_vm1  ;;  %v402_v58 = vld [vmem:[#allocation2 + $0x2] sm:$0x1] }
  0xe3   :  { %v485_v31 = vsel %vm482_vm11, %v484_v21, %v480_v29  ;;  %v489_v41 = vmul.f32 %v712_v30, %v488_v37  ;;  %v498_v42 = vor.u32 1.1754944e-38, %v497_v35  ;;  %vm616_vm4 = vcmask 261120  }
  0xe4   :  { %548 = vperm.xlu1 %694, %v471_v17   ;;  %554 = vperm.xlu2 %695, %v485_v31   ;;  %vm496_vm3 = vcmp.eq.f32.partialorder %v495_v38, 8.507059e+37 }
  0xe5   :  { %536 = vperm.xlu0 %693, %v443_v22   ;;  %v490_v36 = vadd.f32 %v712_v30, %v489_v41 }
  0xe7   :  { %v494_v43 = vsel %vm493_vm2, %v712_v30, %v490_v36 }
  0xe8   :  { %v499_v44 = vsel %vm496_vm3, %v498_v42, %v494_v43 }
  0xec   :  { %572 = vperm.xlu1 %694, %v527_v39   ;;  %560 = vperm.xlu2 %695, %v499_v44  }
  0xed   :  { %566 = vperm.xlu0 %693, %v513_v40  }
 0x13e   :  { %v555_v45 = vpop.permute.xlu2 %554 }
 0x13f   :  { %v557_v47 = vperm.slane %v555_v45, 0 }
 0x141   :  { %v580_v48 = vmul.f32 %v557_v47, %v404_v46 }
 0x143   :  { %608 = vst [vmem:[#allocation1 + $0x4] ss:$9 sm:$0xff] %v580_v48 }
 0x146   :  { %v561_v53 = vpop.permute.xlu2 %560 }
 0x147   :  { %v563_v55 = vperm.slane %v561_v53, 0 }
 0x149   :  { %v581_v56 = vmul.f32 %v563_v55, %v405_v54 }
 0x14b   :  { %610 = vst [vmem:[#allocation1 + $0x5] ss:$9 sm:$0xff] %v581_v56 }
 0x14e   :  { %v543_v57 = vpop.permute.xlu1 %542 }
 0x14f   :  { %v545_v59 = vperm.slane %v543_v57, 0  ;;  %v531_v60 = vpop.permute.xlu0 %530 }
 0x150   :  { %v533_v62 = vperm.slane %v531_v60, 0 }
 0x151   :  { %v578_v63 = vmul.f32 %v545_v59, %v402_v58 }
 0x152   :  { %v576_v0 = vmul.f32 %v533_v62, %v400_v61 }
 0x153   :  { %604 = vst [vmem:[#allocation1 + $0x2] ss:$9 sm:$0xff] %v578_v63 }
 0x154   :  { %600 = vst [vmem:[#allocation1] ss:$9 sm:$0xff] %v576_v0 }
 0x156   :  { %v549_v1 = vpop.permute.xlu1 %548 }
 0x157   :  { %v551_v3 = vperm.slane %v549_v1, 0  ;;  %v537_v4 = vpop.permute.xlu0 %536 }
 0x158   :  { %v539_v6 = vperm.slane %v537_v4, 0 }
 0x159   :  { %v579_v7 = vmul.f32 %v551_v3, %v403_v2 }
 0x15a   :  { %v577_v8 = vmul.f32 %v539_v6, %v401_v5 }
 0x15b   :  { %606 = vst [vmem:[#allocation1 + $0x3] ss:$9 sm:$0xff] %v579_v7 }
 0x15c   :  { %602 = vst [vmem:[#allocation1 + $0x1] ss:$9 sm:$0xff] %v577_v8 }
 0x15e   :  { %v573_v9 = vpop.permute.xlu1 %572 }
 0x15f   :  { %v575_v11 = vperm.slane %v573_v9, 0  ;;  %v567_v12 = vpop.permute.xlu0 %566 }
 0x160   :  { %v569_v14 = vperm.slane %v567_v12, 0 }
 0x161   :  { %v583_v16 = vmul.f32 %v575_v11, %v407_v10 }
 0x162   :  { %v582_v17 = vmul.f32 %v569_v14, %v406_v13 }
 0x163   :  { %614 = vst [vmem:[#allocation1 + $0x7] ss:$9 sm:$0xff] %v583_v16 }
 0x164   :  { %612 = vst [vmem:[#allocation1 + $0x6] ss:$9 sm:$0xff] %v582_v17 }
 0x16b   :  { %v615_v18 = vld [vmem:[#allocation1] sm:$0xff] }
 0x16c   :  { %676 = vmatmul.msk.f32.vlgmr.msra.gmra.mxu0 %vm616_vm4, %v615_v18 }
 0x1e9   :  { %v636_v21 = vpop.f32.mrf.mxu0 }
 0x1ea   :  { %v637_v22 = vadd.f32 %v696_v20, %v636_v21 }
 0x1ec   :  { %639 = vst [vmem:[#allocation12] sm:$0xff] %v637_v22 }
 0x1ed   :  { %650 = dma.vmem_to_hbm [thread:$0]  %s646_s8, 128, %s648_s11, [#allocation8]  }
 0x1ee   :  { %813 = dma.done.wait [#allocation8], 128  }
 0x1ef   :  { %814 = vsyncadd [#allocation8], 4294967168 }
 0x1f0   :  { %655 = vsyncpa [#allocation7], 1 }
 0x1f1   :  { %656 = vsyncpa [#allocation10], 1 }
 0x1f2   :  { %657 = vsyncpa [#allocation8], 1 }

</bundles_post_ra>
